<compile_context>
chip_gen: v7x
topology: tpu7x:2x2x1
jax: 0.10.0
libtpu: 0.0.40
codegen_flags: <defaults>
</compile_context>

<pallas_src>
import math

import jax
import jax.numpy as jnp
from jax.experimental import pallas as pl
from jax.experimental.pallas import tpu as pltpu

_LANE = 128
_MAX_COLS = 8192                  # lane-dense width cap for the 2D view
_TILE_BYTES = 4 * 1024 * 1024     # per-DMA chunk; no VMEM is used, this only sets
                                  # DMA granularity (2 chunks kept in flight)
_MIN_SUBLANES = {8: 8, 4: 8, 2: 16, 1: 32}   # itemsize -> sublane packing


def _make_hbm_copy_kernel(tile_rows, full_tiles, tail_rows):
    """HBM->HBM DMA copy of a (rows, cols) array, chunked along rows.

    The TensorCore only issues DMA descriptors; the DMA engines move the data.
    Two full-size copies are kept outstanding (+1 for the static tail chunk).
    """

    def kernel(x_hbm, o_hbm, sem):
        def full_copy(i, slot):
            s = i * tile_rows
            return pltpu.make_async_copy(
                x_hbm.at[pl.ds(s, tile_rows), :],
                o_hbm.at[pl.ds(s, tile_rows), :],
                sem.at[slot],
            )

        tail_cp = None
        if tail_rows > 0:
            tail_start = full_tiles * tile_rows
            tail_cp = pltpu.make_async_copy(
                x_hbm.at[pl.ds(tail_start, tail_rows), :],
                o_hbm.at[pl.ds(tail_start, tail_rows), :],
                sem.at[2],
            )
            tail_cp.start()

        if full_tiles > 0:
            full_copy(0, 0).start()
        if full_tiles > 1:
            full_copy(1, 1).start()

        if full_tiles > 0:
            @pl.loop(0, full_tiles)
            def _(i):
                full_copy(i, i & 1).wait()

                @pl.when(i + 2 < full_tiles)
                def _():
                    full_copy(i + 2, i & 1).start()

        if tail_cp is not None:
            tail_cp.wait()

    return kernel


@jax.jit
def _pallas_identity_copy(sample: jax.Array) -> jax.Array:
    """Parity/debug path: materialize a copy of `sample` via HBM->HBM DMA."""
    shape = sample.shape
    dtype = sample.dtype
    n = math.prod(shape)
    itemsize = jnp.dtype(dtype).itemsize

    # Lane-dense 2D view: cols = largest multiple of 128 dividing n (capped),
    # so each chunk is whole (8,128) tiles.  Odd sizes fall back to a single
    # flat row — DMA has no lane/sublane divisibility requirement.
    if n % _LANE == 0:
        cols = _LANE
        while cols * 2 <= _MAX_COLS and n % (cols * 2) == 0:
            cols *= 2
    else:
        cols = n
    rows = n // cols
    x2d = sample.reshape(rows, cols)

    bytes_per_row = cols * itemsize
    tile_rows = max(1, _TILE_BYTES // bytes_per_row)
    sub = _MIN_SUBLANES.get(itemsize, 8)
    if tile_rows >= rows:
        tile_rows = rows
    else:
        tile_rows = max(sub, (tile_rows // sub) * sub)

    full_tiles = rows // tile_rows
    tail_rows = rows - full_tiles * tile_rows

    kernel = _make_hbm_copy_kernel(tile_rows, full_tiles, tail_rows)

    out2d = pl.pallas_call(
        kernel,
        out_shape=jax.ShapeDtypeStruct((rows, cols), dtype),
        in_specs=[pl.BlockSpec(memory_space=pl.ANY)],   # stay in HBM, no auto-DMA
        out_specs=pl.BlockSpec(memory_space=pl.ANY),
        scratch_shapes=[pltpu.SemaphoreType.DMA((3,))],
        # Memory-bound custom call: no compute, just 2N bytes of HBM traffic.
        cost_estimate=pl.CostEstimate(
            flops=0, transcendentals=0, bytes_accessed=2 * n * itemsize),
    )(x2d)
    return out2d.reshape(shape)


def optics_forward(sample: jax.Array, *, force_pallas_copy: bool = False) -> jax.Array:
    """Optics.forward: identity.

    Default is a zero-cost pass-through (no HBM read/write at all).  The Pallas
    HBM->HBM DMA copy is only executed when force_pallas_copy=True (parity /
    debug), or never for empty inputs.
    """
    if not force_pallas_copy or sample.size == 0:
        return sample
    return _pallas_identity_copy(sample)


class OpticsPallas:
    """Mirror of the PyTorch Optics module's constructor + forward.

    Only `forward` carries compute (identity); the optical parameters are kept
    for API parity and initialized deterministically in-script.
    """

    def __init__(self, NA=0.7, wavelength=6.6e-07, magnification=10,
                 resolution=1e-06, refractive_index_medium=1.33,
                 padding=(10, 10, 10, 10), output_region=(0, 0, 128, 128),
                 upscale=1):
        self.NA = NA
        self.wavelength = wavelength
        self.magnification = magnification
        self.resolution = resolution
        self.refractive_index_medium = refractive_index_medium
        self.padding = padding
        self.output_region = output_region
        self.upscale = upscale
        # TODO(synk): _pupil / _pad_volume are __init__-time helpers the PyTorch
        # forward never calls; they are intentionally not ported to the hot path.

    def get_voxel_size(self):
        return jnp.asarray(self.resolution / self.magnification, dtype=jnp.float32)

    def get_pixel_size(self):
        return self.get_voxel_size()

    def __call__(self, sample: jax.Array, *, force_pallas_copy: bool = False) -> jax.Array:
        return optics_forward(sample, force_pallas_copy=force_pallas_copy)


if __name__ == "__main__":
    key = jax.random.PRNGKey(0)
    # Small NCHW input consistent with the module's image-style usage.
    x = jax.random.normal(key, (2, 4, 16, 16), dtype=jnp.float32)

    optics = OpticsPallas()

    # Production path: zero-cost identity return (no kernel, no HBM traffic).
    y_fast = jax.block_until_ready(optics(x))
    assert y_fast.shape == x.shape and y_fast.dtype == x.dtype
    assert bool(jnp.all(y_fast == x)), "identity fast path mismatch"

    # Parity/debug path: run the Pallas HBM->HBM DMA copy kernel once.
    y = optics(x, force_pallas_copy=True)
    y = jax.block_until_ready(y)

    assert y.shape == x.shape and y.dtype == x.dtype
    assert bool(jnp.all(y == x)), "identity forward mismatch"
    print("KERNEL_OK")
</pallas_src>

<mosaic_0001>
module attributes {stable_mosaic.version = 11 : i64} {
  func.func @kernel(%arg0: memref<1x2048xf32, #tpu.memory_space<any>>, %arg1: memref<1x2048xf32, #tpu.memory_space<any>>, %arg2: memref<3x!tpu.dma_semaphore, #tpu.memory_space<semaphore_mem>>) attributes {dimension_semantics = [], scalar_prefetch = 0 : i64, scratch_operands = 1 : i64, tpu.core_type = #tpu.core_type<tc>} {
    %c0_i32 = arith.constant 0 : i32
    %c0_i32_0 = arith.constant 0 : i32
    %c0_i32_1 = arith.constant 0 : i32
    %0 = tpu.memref_slice %arg0[%c0_i32_0, %c0_i32_1] : memref<1x2048xf32, #tpu.memory_space<any>> -> memref<1x2048xf32, #tpu.memory_space<any>>
    %c0_i32_2 = arith.constant 0 : i32
    %c0_i32_3 = arith.constant 0 : i32
    %1 = tpu.memref_slice %arg1[%c0_i32_2, %c0_i32_3] : memref<1x2048xf32, #tpu.memory_space<any>> -> memref<1x2048xf32, #tpu.memory_space<any>>
    %2 = tpu.memref_slice %arg2[%c0_i32] : memref<3x!tpu.dma_semaphore, #tpu.memory_space<semaphore_mem>> -> memref<1x!tpu.dma_semaphore, #tpu.memory_space<semaphore_mem>>
    %3 = tpu.memref_squeeze %2 : memref<1x!tpu.dma_semaphore, #tpu.memory_space<semaphore_mem>> -> memref<!tpu.dma_semaphore, #tpu.memory_space<semaphore_mem>>
    tpu.enqueue_dma source(%0 : memref<1x2048xf32, #tpu.memory_space<any>>) target(%1 : memref<1x2048xf32, #tpu.memory_space<any>>) target_semaphore(%3 : memref<!tpu.dma_semaphore, #tpu.memory_space<semaphore_mem>>)
    %c0_i32_4 = arith.constant 0 : i32
    %c1_i32 = arith.constant 1 : i32
    %4 = arith.muli %c0_i32_4, %c1_i32 : i32
    %c0_i32_5 = arith.constant 0 : i32
    %5 = arith.addi %c0_i32_5, %4 : i32
    %c1_i32_6 = arith.constant 1 : i32
    %6 = arith.andi %5, %c1_i32_6 : i32
    %c1_i32_7 = arith.constant 1 : i32
    %7 = arith.muli %5, %c1_i32_7 : i32
    %c0_i32_8 = arith.constant 0 : i32
    %8 = tpu.memref_slice %arg0[%7, %c0_i32_8] : memref<1x2048xf32, #tpu.memory_space<any>> -> memref<1x2048xf32, #tpu.memory_space<any>>
    %c0_i32_9 = arith.constant 0 : i32
    %9 = tpu.memref_slice %arg1[%7, %c0_i32_9] : memref<1x2048xf32, #tpu.memory_space<any>> -> memref<1x2048xf32, #tpu.memory_space<any>>
    %10 = tpu.memref_slice %arg2[%6] : memref<3x!tpu.dma_semaphore, #tpu.memory_space<semaphore_mem>> -> memref<1x!tpu.dma_semaphore, #tpu.memory_space<semaphore_mem>>
    %11 = tpu.memref_squeeze %10 : memref<1x!tpu.dma_semaphore, #tpu.memory_space<semaphore_mem>> -> memref<!tpu.dma_semaphore, #tpu.memory_space<semaphore_mem>>
    tpu.wait_dma2 semaphore(%11 : memref<!tpu.dma_semaphore, #tpu.memory_space<semaphore_mem>>) src(%8 : memref<1x2048xf32, #tpu.memory_space<any>>) dst(%9 : memref<1x2048xf32, #tpu.memory_space<any>>)
    %c2_i32 = arith.constant 2 : i32
    %12 = arith.addi %5, %c2_i32 : i32
    %c1_i32_10 = arith.constant 1 : i32
    %13 = arith.cmpi slt, %12, %c1_i32_10 : i32
    %14 = arith.extui %13 : i1 to i32
    %c0_i32_11 = arith.constant 0 : i32
    %15 = arith.cmpi ne, %14, %c0_i32_11 : i32
    scf.if %15 {
      %c2_i32_13 = arith.constant 2 : i32
      %16 = arith.addi %5, %c2_i32_13 : i32
      %c1_i32_14 = arith.constant 1 : i32
      %17 = arith.andi %5, %c1_i32_14 : i32
      %c1_i32_15 = arith.constant 1 : i32
      %18 = arith.muli %16, %c1_i32_15 : i32
      %c0_i32_16 = arith.constant 0 : i32
      %19 = tpu.memref_slice %arg0[%18, %c0_i32_16] : memref<1x2048xf32, #tpu.memory_space<any>> -> memref<1x2048xf32, #tpu.memory_space<any>>
      %c0_i32_17 = arith.constant 0 : i32
      %20 = tpu.memref_slice %arg1[%18, %c0_i32_17] : memref<1x2048xf32, #tpu.memory_space<any>> -> memref<1x2048xf32, #tpu.memory_space<any>>
      %21 = tpu.memref_slice %arg2[%17] : memref<3x!tpu.dma_semaphore, #tpu.memory_space<semaphore_mem>> -> memref<1x!tpu.dma_semaphore, #tpu.memory_space<semaphore_mem>>
      %22 = tpu.memref_squeeze %21 : memref<1x!tpu.dma_semaphore, #tpu.memory_space<semaphore_mem>> -> memref<!tpu.dma_semaphore, #tpu.memory_space<semaphore_mem>>
      tpu.enqueue_dma source(%19 : memref<1x2048xf32, #tpu.memory_space<any>>) target(%20 : memref<1x2048xf32, #tpu.memory_space<any>>) target_semaphore(%22 : memref<!tpu.dma_semaphore, #tpu.memory_space<semaphore_mem>>)
    } else {
    }
    %c1_i32_12 = arith.constant 1 : i32
    return
  }
}

</mosaic_0001>

<bundles_post_ra>
// kernel: _pallas_identity_copy.1
= control target key start
LH: loop header
LB: loop body
LE: loop exit
PB: predicated region body
PF: predicated region fallthrough
CT: control target
= control target key end

     0   :  { %s108_s0 = inlined_call_operand.vmem [shape: f32[1,2048], index: 0, kind: input, shape index: {}]   ;;  %s109_s1 = inlined_call_operand.vmem [shape: f32[1,2048], index: 1, kind: output, shape index: {}]  }
   0x1   :  { %v38_v0 = vld [vmem:[%s108_s0] sm:$0xff]  ;;  %v40_v1 = vld [vmem:[%s108_s0 + $0x8] sm:$0xff] }
   0x2   :  { %39 = vst [vmem:[%s109_s1] sm:$0xff] %v38_v0  ;;  %41 = vst [vmem:[%s109_s1 + $0x8] sm:$0xff] %v40_v1 }
   0x3   :  { %49 = vsyncadd [#allocation2], 256 }
   0x4   :  { %84 = dma.done.wait [#allocation2], 256 }
   0x5   :  { %85 = vsyncadd [#allocation2], 4294967040 }
   0x6   :  { %53 = vsyncmov [#allocation2] }
   0x9   :  { %s54_s14 = vpop.sfrf %53 }
   0xa   :  { %p81_p0 = scmp.ne.s32.totalorder %s54_s14, 0 }
   0xc   :  { %58 = shalt.err (%p81_p0)  }
   0xd   :  { %60 = vsyncmov [#allocation2 + $0x1] }
  0x10   :  { %s61_s15 = vpop.sfrf %60 }
  0x11   :  { %p82_p1 = scmp.ne.s32.totalorder %s61_s15, 0 }
  0x13   :  { %65 = shalt.err (%p82_p1)  }
  0x14   :  { %67 = vsyncmov [#allocation2 + $0x2] }
  0x17   :  { %s68_s0 = vpop.sfrf %67 }
  0x18   :  { %p83_p2 = scmp.ne.s32.totalorder %s68_s0, 0 }
  0x1a   :  { %72 = shalt.err (%p83_p2)  }

</bundles_post_ra>
